<compile_context>
chip_gen: v7x
topology: tpu7x:2x2x1
jax: 0.10.0
libtpu: 0.0.40
codegen_flags: <defaults>
</compile_context>

<pallas_src>
import functools
import warnings

import jax
import jax.numpy as jnp
from jax.experimental import pallas as pl
from jax.experimental.pallas import tpu as pltpu

_LANE = 128


def _ema_kernel(x_ref, shadow_ref, out_ref, *, mu):
    # Elementwise lerp on the VPU, accumulated in f32 regardless of input dtype.
    xf = x_ref[...].astype(jnp.float32)
    sf = shadow_ref[...].astype(jnp.float32)
    out_ref[...] = ((1.0 - mu) * xf + mu * sf).astype(out_ref.dtype)


def _hw_params():
    """Generation-aware tiling budget (static, decided at trace time)."""
    kind = ""
    try:
        kind = jax.devices()[0].device_kind.lower()
    except Exception:
        pass
    if "v5" in kind:
        # v5e: stay inside the 16 MiB scoped-VMEM default (3 ops x 2 bufs x 2 MiB).
        return dict(block_bytes=2 << 20, vmem_limit=15 << 20, n_cores=1)
    if "v7" in kind:
        # v7x: 64 MiB physical VMEM, 2 TensorCores -> split mid-size work in two.
        return dict(block_bytes=4 << 20, vmem_limit=30 << 20, n_cores=2)
    # v6e (and default): 4 MiB/operand blocks, 24 MiB pipelined, 30 MiB limit.
    return dict(block_bytes=4 << 20, vmem_limit=30 << 20, n_cores=1)


def _ema_2d(x2, s2, mu, *, block_bytes, vmem_limit, n_cores):
    """EMA lerp on a lane-dense (rows, 128) slab; output aliases the shadow slab."""
    rows, lane = x2.shape
    bpe = x2.dtype.itemsize
    # Sublane packing: 8 rows for 4-byte dtypes, 16 for bf16, 32 for int8/fp8.
    pack = (4 // bpe) * 8 if bpe in (1, 2, 4) else 8
    # Byte-sized row block: same VMEM footprint regardless of dtype.
    tr_max = max(pack, (block_bytes // (lane * bpe)) // pack * pack)

    if rows > tr_max:
        tr = tr_max
    elif n_cores >= 2 and rows > pack:
        # >= 2 balanced blocks so the "parallel" grid axis spans both TensorCores.
        tr = min(rows, ((pl.cdiv(rows, 2) + pack - 1) // pack) * pack)
    else:
        tr = rows  # single block == full array dim (always layout-legal)

    grid = (pl.cdiv(rows, tr),)
    spec = pl.BlockSpec((tr, lane), lambda i: (i, 0))
    n_elem = rows * lane

    return pl.pallas_call(
        functools.partial(_ema_kernel, mu=mu),
        out_shape=jax.ShapeDtypeStruct(x2.shape, x2.dtype),
        grid=grid,
        in_specs=[spec, spec],
        out_specs=spec,
        # Reuse the shadow buffer for the output (in-place EMA state update).
        input_output_aliases={1: 0},
        cost_estimate=pl.CostEstimate(
            flops=2 * n_elem,
            transcendentals=0,
            bytes_accessed=3 * n_elem * bpe,
        ),
        compiler_params=pltpu.CompilerParams(
            dimension_semantics=("parallel",),
            vmem_limit_bytes=vmem_limit,
        ),
    )(x2, s2)


@functools.partial(jax.jit, static_argnames=("mu",), donate_argnums=(1,))
def ema_pallas(x, shadow, *, mu=0.999):
    """(1 - mu) * x + mu * shadow via a Pallas TPU kernel.

    `shadow` is donated and its HBM buffer is reused for the output via
    input_output_aliases, matching the in-place state update in EMA.__call__
    (true in-place whenever x.size % 128 == 0, which holds for typical params).
    """
    assert x.shape == shadow.shape and x.dtype == shadow.dtype
    hw = _hw_params()
    orig_shape = x.shape
    n = x.size
    aligned = (n // _LANE) * _LANE

    flat_x = x.reshape(-1)
    flat_s = shadow.reshape(-1)

    if aligned == n:
        # Common case: reshape is a free bitcast of the contiguous buffers.
        out2 = _ema_2d(flat_x.reshape(-1, _LANE), flat_s.reshape(-1, _LANE), mu, **hw)
        return out2.reshape(orig_shape)

    # Ragged size: no jnp.pad (it would copy both inputs and defeat the output
    # aliasing).  Kernel on the 128-aligned prefix; <128-element tail in plain JAX.
    parts = []
    if aligned:
        head = _ema_2d(
            flat_x[:aligned].reshape(-1, _LANE),
            flat_s[:aligned].reshape(-1, _LANE),
            mu,
            **hw,
        )
        parts.append(head.reshape(-1))
    tail = (
        (1.0 - mu) * flat_x[aligned:].astype(jnp.float32)
        + mu * flat_s[aligned:].astype(jnp.float32)
    ).astype(x.dtype)
    parts.append(tail)
    out = parts[0] if len(parts) == 1 else jnp.concatenate(parts)
    return out.reshape(orig_shape)


class EMA:
    """JAX/Pallas port of the PyTorch EMA module (stateful shadow dict)."""

    # TODO(synk): for models with many small parameters, concatenate all shadow
    # tensors into one lane-dense slab and update them with a single pallas_call
    # to amortize the per-call launch overhead.

    def __init__(self, mu=0.999):
        self.mu = mu
        self.shadow = {}

    def register(self, name, val):
        # Private copy: this buffer is later donated to the kernel, so external
        # holders of `val` keep a valid array.
        self.shadow[name] = jnp.array(val)

    def __call__(self, name, x):
        assert name in self.shadow
        new_average = ema_pallas(x, self.shadow[name], mu=self.mu)
        self.shadow[name] = new_average
        return new_average


if __name__ == "__main__":
    key = jax.random.PRNGKey(0)
    k1, k2, k3, k4 = jax.random.split(key, 4)
    mu = 0.999

    # --- main test: NCHW activation-shaped tensor, 128-aligned size ----------
    x = jax.random.normal(k1, (2, 4, 16, 16), dtype=jnp.float32)
    init_val = jax.random.normal(k2, (2, 4, 16, 16), dtype=jnp.float32)
    ref = (1.0 - mu) * x + mu * init_val  # reference computed before any donation

    ema = EMA(mu=mu)
    ema.register("param", init_val)
    out = jax.block_until_ready(ema("param", x))

    assert jnp.allclose(out, ref, atol=1e-6, rtol=1e-6), "mismatch vs reference"
    assert jnp.allclose(ema.shadow["param"], ref, atol=1e-6, rtol=1e-6)

    # --- ragged-size smoke test (aligned-prefix kernel + plain-JAX tail) -----
    xr = jax.random.normal(k3, (5, 7, 11), dtype=jnp.float32)  # 385 elements
    sr = jax.random.normal(k4, (5, 7, 11), dtype=jnp.float32)
    ref_r = (1.0 - mu) * xr + mu * sr
    ema.register("ragged", sr)
    with warnings.catch_warnings():
        warnings.simplefilter("ignore")  # donated buffer may be unusable here
        out_r = jax.block_until_ready(ema("ragged", xr))
    assert jnp.allclose(out_r, ref_r, atol=1e-6, rtol=1e-6), "ragged mismatch"

    print("KERNEL_OK")
</pallas_src>

<mosaic_0001>
module attributes {stable_mosaic.version = 11 : i64} {
  func.func @_ema_kernel(%arg0: i32, %arg1: memref<16x128xf32, #tpu.memory_space<vmem>>, %arg2: memref<16x128xf32, #tpu.memory_space<vmem>>, %arg3: memref<16x128xf32, #tpu.memory_space<vmem>>) attributes {dimension_semantics = [#tpu.dimension_semantics<parallel>], iteration_bounds = array<i64: 1>, scalar_prefetch = 0 : i64, scratch_operands = 0 : i64, tpu.core_type = #tpu.core_type<tc>, window_params = [{transform_indices = @transform_0, window_bounds = array<i64: 16, 128>}, {transform_indices = @transform_1, window_bounds = array<i64: 16, 128>}, {transform_indices = @transform_2, window_bounds = array<i64: 16, 128>}]} {
    %c0 = arith.constant 0 : index
    %c0_0 = arith.constant 0 : index
    %0 = vector.load %arg1[%c0, %c0_0] : memref<16x128xf32, #tpu.memory_space<vmem>>, vector<16x128xf32>
    %c0_1 = arith.constant 0 : index
    %c0_2 = arith.constant 0 : index
    %1 = vector.load %arg2[%c0_1, %c0_2] : memref<16x128xf32, #tpu.memory_space<vmem>>, vector<16x128xf32>
    %cst = arith.constant 1.000000e-03 : f32
    %2 = vector.broadcast %cst : f32 to vector<16x128xf32>
    %3 = arith.mulf %2, %0 : vector<16x128xf32>
    %cst_3 = arith.constant 9.990000e-01 : f32
    %4 = vector.broadcast %cst_3 : f32 to vector<16x128xf32>
    %5 = arith.mulf %4, %1 : vector<16x128xf32>
    %6 = arith.addf %3, %5 : vector<16x128xf32>
    %c0_4 = arith.constant 0 : index
    %c0_5 = arith.constant 0 : index
    %7 = vector.load %arg3[%c0_4, %c0_5] : memref<16x128xf32, #tpu.memory_space<vmem>>, vector<16x128xf32>
    tpu.vector_store %arg3[%c0_4, %c0_5], %6 {strides = array<i32>} : memref<16x128xf32, #tpu.memory_space<vmem>>, vector<16x128xf32>,
    return
  }
  func.func @transform_0(%arg0: i32) -> (i32, i32) {
    %c0_i32 = arith.constant 0 : i32
    %c0_i32_0 = arith.constant 0 : i32
    return %arg0, %c0_i32 : i32, i32
  }
  func.func @transform_1(%arg0: i32) -> (i32, i32) {
    %c0_i32 = arith.constant 0 : i32
    %c0_i32_0 = arith.constant 0 : i32
    return %arg0, %c0_i32 : i32, i32
  }
  func.func @transform_2(%arg0: i32) -> (i32, i32) {
    %c0_i32 = arith.constant 0 : i32
    %c0_i32_0 = arith.constant 0 : i32
    return %arg0, %c0_i32 : i32, i32
  }
}

</mosaic_0001>

<bundles_post_ra>
// kernel: ema_pallas.1
= control target key start
LH: loop header
LB: loop body
LE: loop exit
PB: predicated region body
PF: predicated region fallthrough
CT: control target
= control target key end

     0   :  { %s60_s0 = inlined_call_operand.vmem [shape: f32[16,128], index: 0, kind: input, shape index: {}]   ;;  %s61_s1 = inlined_call_operand.vmem [shape: f32[16,128], index: 1, kind: input, shape index: {}, may-alias: {1,2}]   ;;  %s62_s2 = inlined_call_operand.vmem [shape: f32[16,128], index: 2, kind: output, shape index: {}, may-alias: {1,2}]  }
   0x1   :  { %v11_v0 = vld [vmem:[%s60_s0] sm:$0xff]  ;;  %v12_v2 = vld [vmem:[%s60_s0 + $0x8] sm:$0xff] }
   0x2   :  { %v13_v1 = vld [vmem:[%s61_s1] sm:$0xff]  ;;  %v15_v3 = vmul.f32 0.001, %v11_v0  ;;  %v14_v5 = vld [vmem:[%s61_s1 + $0x8] sm:$0xff]  ;;  %v16_v6 = vmul.f32 0.001, %v12_v2 }
   0x3   :  { %v17_v4 = vmul.f32 0.999, %v13_v1  ;;  %v18_v7 = vmul.f32 0.999, %v14_v5 }
   0x5   :  { %v19_v8 = vadd.f32 %v17_v4, %v15_v3  ;;  %v20_v9 = vadd.f32 %v18_v7, %v16_v6 }
   0x7   :  { %21 = vst [vmem:[%s62_s2] sm:$0xff] %v19_v8  ;;  %22 = vst [vmem:[%s62_s2 + $0x8] sm:$0xff] %v20_v9 }

</bundles_post_ra>
